<compile_context>
chip_gen: v7x
topology: tpu7x:2x2x1
jax: 0.10.0
libtpu: 0.0.40
codegen_flags: <defaults>
</compile_context>

<pallas_src>
import functools

import jax
import jax.numpy as jnp
from jax.experimental import pallas as pl
from jax.experimental.pallas import tpu as pltpu


# --------------------------------------------------------------------------- #
# Kernel                                                                      #
# --------------------------------------------------------------------------- #
def _attention_kernel(enc_ref, decp_ref, ctx_ref,
                      w_enc_t_ref, b_enc_ref, w_w_ref,
                      attn_ref, wts_ref, *, bf16_vpu):
    TB, S, E = enc_ref.shape
    Hp = w_enc_t_ref.shape[1]

    # Encoder projection for the whole (TB, S) slab in ONE MXU matmul:
    # bf16 (TB*S, E) @ bf16 (E, Hp) -> f32 (TB*S, Hp), + f32 bias row.
    enc2d = enc_ref[...].reshape(TB * S, E)
    enc_proj = jnp.dot(enc2d, w_enc_t_ref[...],
                       preferred_element_type=jnp.float32) + b_enc_ref[...]
    enc_proj = enc_proj.reshape(TB, S, Hp)

    # Decoder projection was computed once in the wrapper; broadcast over S.
    x = enc_proj + decp_ref[...].reshape(TB, 1, Hp)          # (TB, S, Hp) f32

    if bf16_vpu:
        # v6e/v7x: bf16 EUP/VPU path for the tanh + score multiply.
        t = jnp.tanh(x.astype(jnp.bfloat16))
        prod = t * w_w_ref[...].astype(jnp.bfloat16).reshape(1, 1, Hp)
        scores = jnp.sum(prod.astype(jnp.float32), axis=-1)  # (TB, S)
    else:
        t = jnp.tanh(x)
        scores = jnp.sum(t * w_w_ref[...].reshape(1, 1, Hp), axis=-1)
    # b_w intentionally dropped: softmax is shift-invariant to a scalar bias.

    # Softmax over the sequence axis, normalization deferred past the
    # S-reduction (EUP reciprocal; divide only TB*C + TB*S elements).
    m = jnp.max(scores, axis=-1, keepdims=True)               # (TB, 1)
    e = jnp.exp(scores - m)                                   # (TB, S)
    denom = jnp.sum(e, axis=-1, keepdims=True)                # (TB, 1)
    inv = pl.reciprocal(denom, approx=True)                   # (TB, 1)

    wts_ref[...] = e * inv
    # attn_out: unnormalized weighted sum over S, then one (TB, C) scale.
    attn_unnorm = jnp.sum(e[:, :, None] * ctx_ref[...], axis=1)   # (TB, C) f32
    attn_ref[...] = attn_unnorm * inv


# --------------------------------------------------------------------------- #
# Hardware-aware tile / VMEM selection                                        #
# --------------------------------------------------------------------------- #
def _device_kind():
    try:
        return jax.devices()[0].device_kind.lower()
    except Exception:  # pragma: no cover - defensive
        return ""


def _is_v7(kind):
    return ("v7" in kind) or ("7x" in kind)


def _has_bf16_vpu(kind):
    # bf16 VPU/EUP exists on v6e and v7x; NOT on v5e (or older).
    return ("v6" in kind) or _is_v7(kind)


def _vmem_capacity_bytes(kind):
    try:
        cap = int(pltpu.get_tpu_info().vmem_capacity_bytes)
        if cap > 0:
            return cap
    except Exception:
        pass
    # Fallback by generation: v7x has 64 MiB per TensorCore, v5e/v6e 128 MiB.
    return (64 if _is_v7(kind) else 128) * 1024 * 1024


def _select_tile_and_vmem(B, S, E, C, Hp, kind):
    """Pick the batch tile TB from a VMEM byte budget and a vmem limit."""
    vmem_cap = _vmem_capacity_bytes(kind)
    # Use at most ~60% of physical VMEM for our accounted footprint
    # (>= 20% headroom for compiler internals, semaphores, spills).
    budget = int(min(vmem_cap, 128 * 1024 * 1024) * 0.6)

    per_row = (2 * (S * E * 2)        # enc block, bf16, double-buffered
               + 2 * (S * C * 2)      # context block, bf16, double-buffered
               + 2 * (Hp * 4)         # dec_proj block, f32, double-buffered
               + 2 * (C * 4)          # attn output block, double-buffered
               + 2 * (S * 4)          # weights output block, double-buffered
               + 4 * (S * Hp * 4))    # in-kernel f32 temporaries (enc_proj/x/t/e)
    fixed = (2 * (E * Hp * 2)         # grid-invariant w_enc^T (bf16)
             + 4 * (Hp * 4)           # b_enc, w_w rows (f32)
             + (1 << 20))             # slack

    if B <= 8:
        tb = B                        # single block, equals full batch extent
    else:
        tb_budget = max(8, (budget - fixed) // per_row)
        tb = max(8, min((tb_budget // 8) * 8, 512))
        b_pad8 = ((B + 7) // 8) * 8
        tb = min(tb, b_pad8)          # don't over-pad the batch
        # v7x: 2 TensorCores per chip -> guarantee >= 2 blocks on the
        # "parallel" batch grid axis when the batch allows it.
        if _is_v7(kind) and B >= 16:
            tb = min(tb, max(8, (B // 16) * 8))

    needed = fixed + tb * per_row
    vmem_limit = int(min(vmem_cap * 0.9,
                         max(needed * 1.25, 32 * 1024 * 1024)))
    return tb, vmem_limit


# --------------------------------------------------------------------------- #
# Wrapper                                                                     #
# --------------------------------------------------------------------------- #
def bigru_attention_forward(enc, dec, context, params):
    B, S, E = enc.shape
    C = context.shape[2]
    H = params["w_enc"].shape[0]
    kind = _device_kind()

    # Pad H to a lane-dense multiple of 128 (zero padding is numerically exact).
    Hp = max(128, ((H + 127) // 128) * 128)

    # Pre-transpose / pad / cast weights once (layout plumbing outside kernel).
    w_enc_t = jnp.zeros((E, Hp), jnp.float32).at[:, :H].set(params["w_enc"].T)
    w_enc_t = w_enc_t.astype(jnp.bfloat16)                      # (E, Hp) bf16
    b_enc = jnp.zeros((1, Hp), jnp.float32).at[:, :H].set(
        params["b_enc"].reshape(1, H))
    w_w = jnp.zeros((1, Hp), jnp.float32).at[:, :H].set(
        params["w_w"].reshape(1, H))
    # b_w dropped: softmax is shift-invariant to a per-row scalar bias.

    # Hoist the decoder projection: one (B, D) @ (D, H) matmul for the whole
    # batch instead of B tiny matvecs inside the sequential grid loop.
    dec_proj = dec @ params["w_dec"].T + params["b_dec"].reshape(1, H)  # (B, H)
    dec_proj = jnp.zeros((B, Hp), jnp.float32).at[:, :H].set(dec_proj)

    # Cast the two streaming inputs to bf16 (f32 accumulation in-kernel).
    enc_b = enc.astype(jnp.bfloat16)
    ctx_b = context.astype(jnp.bfloat16)

    # VMEM-budgeted, generation-aware batch tile.
    TB, vmem_limit = _select_tile_and_vmem(B, S, E, C, Hp, kind)
    n_blocks = (B + TB - 1) // TB
    B_pad = n_blocks * TB
    if B_pad != B:
        pad = B_pad - B
        enc_b = jnp.pad(enc_b, ((0, pad), (0, 0), (0, 0)))
        ctx_b = jnp.pad(ctx_b, ((0, pad), (0, 0), (0, 0)))
        dec_proj = jnp.pad(dec_proj, ((0, pad), (0, 0)))

    grid_spec = pltpu.PrefetchScalarGridSpec(
        num_scalar_prefetch=0,
        grid=(n_blocks,),
        in_specs=[
            pl.BlockSpec((TB, S, E), lambda b: (b, 0, 0)),   # enc (bf16)
            pl.BlockSpec((TB, Hp),   lambda b: (b, 0)),      # dec_proj (f32)
            pl.BlockSpec((TB, S, C), lambda b: (b, 0, 0)),   # context (bf16)
            pl.BlockSpec((E, Hp),    lambda b: (0, 0)),      # w_enc^T (bf16)
            pl.BlockSpec((1, Hp),    lambda b: (0, 0)),      # b_enc (f32)
            pl.BlockSpec((1, Hp),    lambda b: (0, 0)),      # w_w row (f32)
        ],
        out_specs=[
            pl.BlockSpec((TB, C), lambda b: (b, 0)),
            pl.BlockSpec((TB, S), lambda b: (b, 0)),
        ],
    )

    cost = pl.CostEstimate(
        flops=int(2 * B_pad * S * E * Hp + 4 * B_pad * S * Hp
                  + 2 * B_pad * S * C + 6 * B_pad * S),
        transcendentals=int(B_pad * S * Hp + B_pad * S + B_pad),
        bytes_accessed=int(B_pad * S * E * 2 + B_pad * S * C * 2
                           + B_pad * Hp * 4 + E * Hp * 2 + 2 * Hp * 4
                           + B_pad * C * 4 + B_pad * S * 4),
    )

    kernel = functools.partial(_attention_kernel, bf16_vpu=_has_bf16_vpu(kind))

    attn_out, weights = pl.pallas_call(
        kernel,
        out_shape=(
            jax.ShapeDtypeStruct((B_pad, C), jnp.float32),
            jax.ShapeDtypeStruct((B_pad, S), jnp.float32),
        ),
        grid_spec=grid_spec,
        compiler_params=pltpu.CompilerParams(
            dimension_semantics=("parallel",),   # shards across TCs on v7x
            vmem_limit_bytes=vmem_limit),
        cost_estimate=cost,
    )(enc_b, dec_proj, ctx_b, w_enc_t, b_enc, w_w)

    return attn_out[:B], weights[:B]


# --------------------------------------------------------------------------- #
# Params / reference / demo                                                   #
# --------------------------------------------------------------------------- #
def init_params(key, enc_dim, dec_dim, hidden_size):
    """Deterministic PyTorch-Linear-style init (uniform +-1/sqrt(fan_in))."""
    ks = jax.random.split(key, 6)

    def lin(kw, kb, out_f, in_f):
        bound = 1.0 / jnp.sqrt(in_f)
        w = jax.random.uniform(kw, (out_f, in_f), jnp.float32, -bound, bound)
        b = jax.random.uniform(kb, (out_f,), jnp.float32, -bound, bound)
        return w, b

    w_enc, b_enc = lin(ks[0], ks[1], hidden_size, enc_dim)
    w_dec, b_dec = lin(ks[2], ks[3], hidden_size, dec_dim)
    w_w, b_w = lin(ks[4], ks[5], 1, hidden_size)
    return {"w_enc": w_enc, "b_enc": b_enc,
            "w_dec": w_dec, "b_dec": b_dec,
            "w_w": w_w, "b_w": b_w}


def _reference(enc, dec, context, p):
    enc_p = jnp.einsum("bse,he->bsh", enc, p["w_enc"]) + p["b_enc"]
    dec_p = (dec @ p["w_dec"].T + p["b_dec"])[:, None, :]
    t = jnp.tanh(enc_p + dec_p)
    scores = jnp.einsum("bsh,oh->bso", t, p["w_w"])[..., 0] + p["b_w"][0]
    w = jax.nn.softmax(scores, axis=1)
    attn = jnp.einsum("bs,bsc->bc", w, context)
    return attn, w


if __name__ == "__main__":
    B, S = 2, 8
    ENC_DIM, DEC_DIM, HIDDEN, CTX_DIM = 16, 16, 32, 16

    key = jax.random.PRNGKey(0)
    k_enc, k_dec, k_ctx, k_param = jax.random.split(key, 4)

    enc = jax.random.normal(k_enc, (B, S, ENC_DIM), jnp.float32)
    dec = jax.random.normal(k_dec, (B, DEC_DIM), jnp.float32)
    context = jax.random.normal(k_ctx, (B, S, CTX_DIM), jnp.float32)
    params = init_params(k_param, ENC_DIM, DEC_DIM, HIDDEN)

    attn_out, weights = bigru_attention_forward(enc, dec, context, params)
    attn_out = jax.block_until_ready(attn_out)
    weights = jax.block_until_ready(weights)

    ref_attn, ref_w = _reference(enc, dec, context, params)
    assert attn_out.shape == (B, CTX_DIM) and weights.shape == (B, S)
    # bf16 streaming inputs + approx reciprocal -> relaxed tolerance vs f32 ref.
    assert jnp.allclose(attn_out, ref_attn, atol=2e-2, rtol=2e-2)
    assert jnp.allclose(weights, ref_w, atol=2e-2, rtol=2e-2)
    assert bool(jnp.all(jnp.isfinite(attn_out))) and bool(jnp.all(jnp.isfinite(weights)))

    print("KERNEL_OK")
</pallas_src>

<mosaic_0001>
module attributes {stable_mosaic.version = 11 : i64} {
  func.func @_attention_kernel(%arg0: i32, %arg1: memref<2x8x16xbf16, #tpu.memory_space<vmem>>, %arg2: memref<2x128xf32, #tpu.memory_space<vmem>>, %arg3: memref<2x8x16xbf16, #tpu.memory_space<vmem>>, %arg4: memref<16x128xbf16, #tpu.memory_space<vmem>>, %arg5: memref<1x128xf32, #tpu.memory_space<vmem>>, %arg6: memref<1x128xf32, #tpu.memory_space<vmem>>, %arg7: memref<2x16xf32, #tpu.memory_space<vmem>>, %arg8: memref<2x8xf32, #tpu.memory_space<vmem>>) attributes {dimension_semantics = [#tpu.dimension_semantics<parallel>], iteration_bounds = array<i64: 1>, scalar_prefetch = 0 : i64, scratch_operands = 0 : i64, tpu.core_type = #tpu.core_type<tc>, window_params = [{transform_indices = @transform_0, window_bounds = array<i64: 2, 8, 16>}, {transform_indices = @transform_1, window_bounds = array<i64: 2, 128>}, {transform_indices = @transform_2, window_bounds = array<i64: 2, 8, 16>}, {pipeline_mode = #tpu.pipeline_mode<synchronous>, transform_indices = @transform_3, window_bounds = array<i64: 16, 128>}, {pipeline_mode = #tpu.pipeline_mode<synchronous>, transform_indices = @transform_4, window_bounds = array<i64: 1, 128>}, {pipeline_mode = #tpu.pipeline_mode<synchronous>, transform_indices = @transform_5, window_bounds = array<i64: 1, 128>}, {transform_indices = @transform_6, window_bounds = array<i64: 2, 16>}, {transform_indices = @transform_7, window_bounds = array<i64: 2, 8>}]} {
    %c0 = arith.constant 0 : index
    %c0_0 = arith.constant 0 : index
    %c0_1 = arith.constant 0 : index
    %0 = vector.load %arg1[%c0, %c0_0, %c0_1] : memref<2x8x16xbf16, #tpu.memory_space<vmem>>, vector<2x8x16xbf16>
    %1 = vector.shape_cast %0 : vector<2x8x16xbf16> to vector<16x16xbf16>
    %c0_2 = arith.constant 0 : index
    %c0_3 = arith.constant 0 : index
    %2 = vector.load %arg4[%c0_2, %c0_3] : memref<16x128xbf16, #tpu.memory_space<vmem>>, vector<16x128xbf16>
    %cst = arith.constant dense<0.000000e+00> : vector<16x128xf32>
    %3 = tpu.matmul %1, %2, %cst {dimension_numbers = #tpu.dot_dimension_numbers<[1], [0], [0], [1], [0, 0, 1, 1], [], []>} : vector<16x16xbf16>, vector<16x128xbf16>, vector<16x128xf32> -> vector<16x128xf32>
    %c0_4 = arith.constant 0 : index
    %c0_5 = arith.constant 0 : index
    %4 = vector.load %arg5[%c0_4, %c0_5] : memref<1x128xf32, #tpu.memory_space<vmem>>, vector<1x128xf32>
    %5 = vector.broadcast %4 : vector<1x128xf32> to vector<16x128xf32>
    %6 = arith.addf %3, %5 : vector<16x128xf32>
    %7 = vector.shape_cast %6 : vector<16x128xf32> to vector<2x8x128xf32>
    %c0_6 = arith.constant 0 : index
    %c0_7 = arith.constant 0 : index
    %8 = vector.load %arg2[%c0_6, %c0_7] : memref<2x128xf32, #tpu.memory_space<vmem>>, vector<2x128xf32>
    %9 = vector.shape_cast %8 : vector<2x128xf32> to vector<2x1x128xf32>
    %10 = vector.broadcast %9 : vector<2x1x128xf32> to vector<2x8x128xf32>
    %11 = arith.addf %7, %10 : vector<2x8x128xf32>
    %12 = math.tanh %11 : vector<2x8x128xf32>
    %c0_8 = arith.constant 0 : index
    %c0_9 = arith.constant 0 : index
    %13 = vector.load %arg6[%c0_8, %c0_9] : memref<1x128xf32, #tpu.memory_space<vmem>>, vector<1x128xf32>
    %14 = vector.shape_cast %13 : vector<1x128xf32> to vector<1x1x128xf32>
    %15 = vector.broadcast %14 : vector<1x1x128xf32> to vector<2x8x128xf32>
    %16 = arith.mulf %12, %15 : vector<2x8x128xf32>
    %cst_10 = arith.constant dense<0.000000e+00> : vector<2x8xf32>
    %17 = vector.multi_reduction <add>, %16, %cst_10 [2] : vector<2x8x128xf32> to vector<2x8xf32>
    %cst_11 = arith.constant dense<0xFF800000> : vector<2xf32>
    %18 = vector.multi_reduction <maximumf>, %17, %cst_11 [1] : vector<2x8xf32> to vector<2xf32>
    %19 = vector.shape_cast %18 : vector<2xf32> to vector<2x1xf32>
    %20 = vector.broadcast %19 : vector<2x1xf32> to vector<2x8xf32>
    %21 = arith.subf %17, %20 : vector<2x8xf32>
    %22 = math.exp %21 : vector<2x8xf32>
    %cst_12 = arith.constant dense<0.000000e+00> : vector<2xf32>
    %23 = vector.multi_reduction <add>, %22, %cst_12 [1] : vector<2x8xf32> to vector<2xf32>
    %24 = vector.shape_cast %23 : vector<2xf32> to vector<2x1xf32>
    %25 = tpu.reciprocal %24 {approx = true} : vector<2x1xf32> -> vector<2x1xf32>
    %26 = vector.broadcast %25 : vector<2x1xf32> to vector<2x8xf32>
    %27 = arith.mulf %22, %26 : vector<2x8xf32>
    %c0_13 = arith.constant 0 : index
    %c0_14 = arith.constant 0 : index
    %28 = vector.load %arg8[%c0_13, %c0_14] : memref<2x8xf32, #tpu.memory_space<vmem>>, vector<2x8xf32>
    tpu.vector_store %arg8[%c0_13, %c0_14], %27 {strides = array<i32>} : memref<2x8xf32, #tpu.memory_space<vmem>>, vector<2x8xf32>,
    %29 = vector.shape_cast %22 : vector<2x8xf32> to vector<2x8x1xf32>
    %c0_15 = arith.constant 0 : index
    %c0_16 = arith.constant 0 : index
    %c0_17 = arith.constant 0 : index
    %30 = vector.load %arg3[%c0_15, %c0_16, %c0_17] : memref<2x8x16xbf16, #tpu.memory_space<vmem>>, vector<2x8x16xbf16>
    %31 = arith.extf %30 : vector<2x8x16xbf16> to vector<2x8x16xf32>
    %32 = vector.broadcast %29 : vector<2x8x1xf32> to vector<2x8x16xf32>
    %33 = arith.mulf %32, %31 : vector<2x8x16xf32>
    %cst_18 = arith.constant dense<0.000000e+00> : vector<2x16xf32>
    %34 = vector.multi_reduction <add>, %33, %cst_18 [1] : vector<2x8x16xf32> to vector<2x16xf32>
    %35 = vector.broadcast %25 : vector<2x1xf32> to vector<2x16xf32>
    %36 = arith.mulf %34, %35 : vector<2x16xf32>
    %c0_19 = arith.constant 0 : index
    %c0_20 = arith.constant 0 : index
    %37 = vector.load %arg7[%c0_19, %c0_20] : memref<2x16xf32, #tpu.memory_space<vmem>>, vector<2x16xf32>
    tpu.vector_store %arg7[%c0_19, %c0_20], %36 {strides = array<i32>} : memref<2x16xf32, #tpu.memory_space<vmem>>, vector<2x16xf32>,
    return
  }
  func.func @transform_0(%arg0: i32) -> (i32, i32, i32) {
    %c0_i32 = arith.constant 0 : i32
    %c0_i32_0 = arith.constant 0 : i32
    %c0_i32_1 = arith.constant 0 : i32
    return %arg0, %c0_i32, %c0_i32_0 : i32, i32, i32
  }
  func.func @transform_1(%arg0: i32) -> (i32, i32) {
    %c0_i32 = arith.constant 0 : i32
    %c0_i32_0 = arith.constant 0 : i32
    return %arg0, %c0_i32 : i32, i32
  }
  func.func @transform_2(%arg0: i32) -> (i32, i32, i32) {
    %c0_i32 = arith.constant 0 : i32
    %c0_i32_0 = arith.constant 0 : i32
    %c0_i32_1 = arith.constant 0 : i32
    return %arg0, %c0_i32, %c0_i32_0 : i32, i32, i32
  }
  func.func @transform_3(%arg0: i32) -> (i32, i32) {
    %c0_i32 = arith.constant 0 : i32
    %c0_i32_0 = arith.constant 0 : i32
    %c0_i32_1 = arith.constant 0 : i32
    return %c0_i32, %c0_i32_0 : i32, i32
  }
  func.func @transform_4(%arg0: i32) -> (i32, i32) {
    %c0_i32 = arith.constant 0 : i32
    %c0_i32_0 = arith.constant 0 : i32
    %c0_i32_1 = arith.constant 0 : i32
    return %c0_i32, %c0_i32_0 : i32, i32
  }
  func.func @transform_5(%arg0: i32) -> (i32, i32) {
    %c0_i32 = arith.constant 0 : i32
    %c0_i32_0 = arith.constant 0 : i32
    %c0_i32_1 = arith.constant 0 : i32
    return %c0_i32, %c0_i32_0 : i32, i32
  }
  func.func @transform_6(%arg0: i32) -> (i32, i32) {
    %c0_i32 = arith.constant 0 : i32
    %c0_i32_0 = arith.constant 0 : i32
    return %arg0, %c0_i32 : i32, i32
  }
  func.func @transform_7(%arg0: i32) -> (i32, i32) {
    %c0_i32 = arith.constant 0 : i32
    %c0_i32_0 = arith.constant 0 : i32
    return %arg0, %c0_i32 : i32, i32
  }
}

</mosaic_0001>

<bundles_post_ra>
// kernel: tpu_custom_call.1
= control target key start
LH: loop header
LB: loop body
LE: loop exit
PB: predicated region body
PF: predicated region fallthrough
CT: control target
= control target key end

     0   :  { %13 = vsyncpa [#allocation3], 0  ;;  %s606_s0 = inlined_call_operand.hbm [shape: bf16[2,8,16], index: 0, kind: input, shape index: {}]   ;;  %s607_s1 = inlined_call_operand.vmem [shape: f32[2,128], index: 1, kind: input, shape index: {}]   ;;  %s608_s2 = inlined_call_operand.hbm [shape: bf16[2,8,16], index: 2, kind: input, shape index: {}]   ;;  %s609_s3 = inlined_call_operand.vmem [shape: bf16[16,128], index: 3, kind: input, shape index: {}]   ;;  %s610_s4 = inlined_call_operand.vmem [shape: f32[1,128], index: 4, kind: input, shape index: {}]   ;;  %s611_s5 = inlined_call_operand.vmem [shape: f32[1,128], index: 5, kind: input, shape index: {}]   ;;  %s612_s6 = inlined_call_operand.hbm [shape: f32[2,16], index: 6, kind: output, shape index: {0}]   ;;  %s613_s7 = inlined_call_operand.hbm [shape: f32[2,8], index: 7, kind: output, shape index: {1}]  }
   0x1   :  { %14 = vsyncpa [#allocation6], 0 }
   0x2   :  { %15 = vsyncpa [#allocation4], 0 }
   0x3   :  { %16 = vsyncpa [#allocation9], 0  ;;  %s466_s24 = smov [#allocation2]   ;;  %s370_s28 = scalar_lea.hbm %s606_s0, 128 }
   0x4   :  { %s22_s25 = sshll.u32 %s466_s24, 4  ;;  %p371_p0 = scmp.ne.s32.totalorder %s606_s0, %s370_s28  ;;  %s23_s25 = int_to_ptr.vmem [resolvable:$true] %s22_s25 }
   0x5   :  { %p374_p1 = scmp.lt.u32.totalorder %s370_s28, %s606_s0 }
   0x7   :  { %p376_p2 = pnand %p374_p1, %p371_p0 }
   0x9   :  { %379 = shalt.err (!%p376_p2)
}
   0xa   :  { %s380_s10 = scalar_lea.vmem %s23_s25, 128  ;;  %p385_p4 = scmp.lt.s32.totalorder %s23_s25, %s23_s25 }
   0xb   :  { %p381_p3 = scmp.ne.s32.totalorder %s23_s25, %s380_s10  ;;  %p386_p5 = scmp.lt.s32.totalorder %s380_s10, %s380_s10 }
   0xd   :  { %p387_p6 = por %p386_p5, %p385_p4 }
   0xf   :  { %p388_p7 = pnand %p387_p6, %p381_p3 }
  0x11   :  { %391 = shalt.err (!%p388_p7)
}
  0x12   :  { %s467_s11 = smov 64   ;;  %s468_s12 = smov 4  }
  0x13   :  { %28 = dma.hbm_to_vmem [thread:$0]  %s606_s0, 128, %s23_s25, [#allocation3], %s467_s11, %s467_s11, %s468_s12  }
  0x14   :  { %s469_s15 = smov [#allocation5]   ;;  %s392_s19 = scalar_lea.hbm %s608_s2, 128 }
  0x15   :  { %s36_s16 = sshll.u32 %s469_s15, 4  ;;  %p393_p8 = scmp.ne.s32.totalorder %s608_s2, %s392_s19  ;;  %s37_s16 = int_to_ptr.vmem [resolvable:$true] %s36_s16 }
  0x16   :  { %p396_p9 = scmp.lt.u32.totalorder %s392_s19, %s608_s2 }
  0x18   :  { %p398_p10 = pnand %p396_p9, %p393_p8 }
  0x1a   :  { %401 = shalt.err (!%p398_p10)
}
  0x1b   :  { %s402_s24 = scalar_lea.vmem %s37_s16, 128  ;;  %p407_p12 = scmp.lt.s32.totalorder %s37_s16, %s37_s16 }
  0x1c   :  { %p403_p11 = scmp.ne.s32.totalorder %s37_s16, %s402_s24  ;;  %p408_p13 = scmp.lt.s32.totalorder %s402_s24, %s402_s24 }
  0x1e   :  { %p409_p0 = por %p408_p13, %p407_p12 }
  0x20   :  { %p410_p1 = pnand %p409_p0, %p403_p11 }
  0x22   :  { %413 = shalt.err (!%p410_p1)
}
  0x23   :  { %42 = dma.hbm_to_vmem [thread:$0]  %s608_s2, 128, %s37_s16, [#allocation6], %s467_s11, %s467_s11, %s468_s12  }
  0x24   :  { %458 = dma.done.wait [#allocation3], 128  }
  0x25   :  { %459 = vsyncadd [#allocation3], 4294967168 }
  0x26   :  { %460 = dma.done.wait [#allocation6], 128  }
  0x27   :  { %461 = vsyncadd [#allocation6], 4294967168  ;;  %v470_v0 = vmov 0.0   ;;  %vm471_vm0 = vmmov 0   ;;  %v358_v1 = vld [vmem:[%s609_s3] sm:$0xff]   ;;  %vm78_vm1 = vcmask 130048   ;;  %v136_v5 = vlaneseq }
  0x28   :  { %340 = vmatprep.subr.bf16.mxu0 %v470_v0  ;;  %342 = vmatprep.mubr.msk.bf16.mxu0 %vm471_vm0, %v470_v0  ;;  %v359_v2 = vld [vmem:[#allocation2] sm:$0xff]   ;;  %v472_v3 = vmov 1966171168   ;;  %vm186_vm2 = vcmask 1041409   ;;  %vm189_vm3 = vcmask 58368   ;;  %v473_v38 = vmov 0  }
  0x29   :  { %341 = vmatpush3.bf16.msra.mxu0 %v358_v1  ;;  %v134_v4 = vunpack.c.l.s4 %v472_v3  ;;  %v544_v7 = vshrl.u32 %v136_v5, 7  ;;  %v332_v8 = vld.sshfl [vmem:[%s607_s1] sm:$0x11 pattern:$0x75316420]  ;;  %v177_v30 = vand.u32 127, %v136_v5  ;;  %357 = vset.pattern.permute.xlu0 %v473_v38 }
  0x2a   :  { %v132_v10 = vcombine.high %v332_v8, %v332_v8  ;;  %v328_v14 = vld [vmem:[%s610_s4] ss:$0 sm:$0xff]  ;;  %356 = vset.pattern.permute.xlu1 %v473_v38  ;;  %v335_v55 = vld [vmem:[#allocation5] sm:$0xff]   ;;  %vm296_vm4 = vcmask 123904   ;;  %s474_s4 = smov [#allocation7]  }
  0x2b   :  { %v135_v6 = vunpack.c.0.s8 %v134_v4  ;;  %v551_v12 = vsub.s32 0, %v544_v7  ;;  %v333_v25 = vld [vmem:[%s611_s5] ss:$0 sm:$0xff]  ;;  %v562_v32 = vsub.s32 %v177_v30, %v544_v7  ;;  %v200_v39 = vsub.s32 1, %v544_v7  ;;  %s304_s5 = sshll.u32 %s474_s4, 4  ;;  %s305_s5 = int_to_ptr.vmem [resolvable:$true] %s304_s5 }
  0x2c   :  { %343 = vmatmul.mubr.msk.bf16.vlgmr.msra.gmra.mrb[0].mxu0 %vm78_vm1, %v359_v2  ;;  %v337_v56 = vunpack.c.h.bf16 %v335_v55  ;;  %v336_v57 = vunpack.c.l.bf16 %v335_v55  ;;  %s414_s8 = scalar_lea.vmem %s305_s5, 32  ;;  %p419_p3 = scmp.lt.s32.totalorder %s305_s5, %s305_s5 }
  0x2d   :  { %v138_v9 = vsub.s32 %v135_v6, %v544_v7  ;;  %p415_p2 = scmp.ne.s32.totalorder %s305_s5, %s414_s8  ;;  %p420_p4 = scmp.lt.s32.totalorder %s414_s8, %s414_s8 }
  0x2f   :  { %v139_v11 = vrot.slane %v332_v8, %v138_v9  ;;  %v146_v13 = vrot.slane %v132_v10, %v138_v9  ;;  %p421_p5 = por %p420_p4, %p419_p3 }
  0x31   :  { %v150_v15 = vrot.slane %v139_v11, %v551_v12  ;;  %v154_v19 = vrot.slane %v146_v13, %v551_v12  ;;  %p422_p6 = pnand %p421_p5, %p415_p2 }
  0xff   :  { %v116_v16 = vpop.f32.mrb[0].mxu0 }
 0x100   :  { %v117_v17 = vadd.f32 %v328_v14, %v116_v16  ;;  %v344_v18 = vpop.f32.mrb[1].mxu0 }
 0x101   :  { %v119_v20 = vpop.f32.mrb[2].mxu0 }
 0x102   :  { %v157_v21 = vadd.f32 %v150_v15, %v117_v17  ;;  %v120_v22 = vadd.f32 %v328_v14, %v119_v20  ;;  %v345_v23 = vpop.f32.mrb[3].mxu0 }
 0x104   :  { %360 = vtanh.f32 %v157_v21  ;;  %v158_v24 = vadd.f32 %v154_v19, %v120_v22 }
 0x106   :  { %362 = vtanh.f32 %v158_v24 }
 0x10e   :  { %v361_v26 = vpop.eup %360 }
 0x10f   :  { %v168_v27 = vmul.f32 %v361_v26, %v333_v25 }
 0x110   :  { %v363_v28 = vpop.eup %362 }
 0x111   :  { %170 = vadd.xlane.f32.xlu0 %v168_v27  ;;  %v169_v29 = vmul.f32 %v363_v28, %v333_v25 }
 0x115   :  { %172 = vadd.xlane.f32.xlu0 %v169_v29 }
 0x19e   :  { %v171_v31 = vpop.xlane.xlu0 %170 }
 0x19f   :  { %v181_v34 = vrot.slane %v171_v31, %v562_v32 }
 0x1a2   :  { %v173_v33 = vpop.xlane.xlu0 %172 }
 0x1a3   :  { %v185_v35 = vrot.slane %v173_v33, %v562_v32 }
 0x1a5   :  { %v187_v36 = vsel %vm186_vm2, %v185_v35, %v181_v34 }
 0x1a6   :  { %v190_v37 = vsel %vm189_vm3, %v187_v36, -inf }
 0x1a7   :  { %191 = vmax.xlane.f32.xlu1 %v190_v37 }
 0x234   :  { %v192_v40 = vpop.xlane.xlu1 %191 }
 0x235   :  { %v197_v41 = vrot.slane %v192_v40, %v551_v12  ;;  %v201_v42 = vrot.slane %v192_v40, %v200_v39 }
 0x237   :  { %v204_v43 = vsub.f32 %v171_v31, %v197_v41  ;;  %v205_v44 = vsub.f32 %v173_v33, %v201_v42 }
 0x239   :  { %v206_v45 = vmul.f32 1.442695, %v204_v43  ;;  %v208_v46 = vmul.f32 1.442695, %v205_v44 }
 0x23b   :  { %364 = vpow2.f32 %v206_v45 }
 0x23c   :  { %366 = vpow2.f32 %v208_v46 }
 0x245   :  { %v365_v47 = vpop.eup %364 }
 0x246   :  { %v367_v48 = vpop.eup %366  ;;  %213 = vperm.xlu1 %356, %v365_v47  }
 0x247   :  { %216 = vperm.xlu0 %357, %v367_v48  }
 0x2c5   :  { %v214_v49 = vpop.permute.xlu1 %213 }
 0x2c6   :  { %v217_v50 = vpop.permute.xlu0 %216  ;;  %v221_v51 = vrot.slane %v214_v49, %v562_v32  ;;  %v270_v59 = vmul.f32 %v336_v57, %v214_v49 }
 0x2c7   :  { %v225_v52 = vrot.slane %v217_v50, %v562_v32  ;;  %v271_v58 = vmul.f32 %v337_v56, %v217_v50 }
 0x2c8   :  { %v272_v61 = vsel %vm78_vm1, %v270_v59, 0.0 }
 0x2c9   :  { %v226_v53 = vsel %vm186_vm2, %v225_v52, %v221_v51  ;;  %v279_v60 = vsel %vm78_vm1, %v271_v58, 0.0  ;;  %v273_v63 = vrot.slane %v272_v61, 4 }
 0x2ca   :  { %v228_v54 = vsel %vm189_vm3, %v226_v53, 0.0  ;;  %v280_v62 = vrot.slane %v279_v60, 4 }
 0x2cb   :  { %229 = vadd.xlane.f32.xlu1 %v228_v54  ;;  %v274_v1 = vadd.f32 %v273_v63, %v272_v61 }
 0x2cc   :  { %v281_v0 = vadd.f32 %v280_v62, %v279_v60 }
 0x2cd   :  { %v275_v4 = vrot.slane %v274_v1, 2 }
 0x2ce   :  { %v282_v2 = vrot.slane %v281_v0, 2 }
 0x2cf   :  { %v276_v6 = vadd.f32 %v275_v4, %v274_v1 }
 0x2d0   :  { %v283_v5 = vadd.f32 %v282_v2, %v281_v0 }
 0x2d1   :  { %v277_v8 = vrot.slane %v276_v6, 1 }
 0x2d2   :  { %v284_v7 = vrot.slane %v283_v5, 1 }
 0x2d3   :  { %v278_v14 = vadd.f32 %v277_v8, %v276_v6 }
 0x2d4   :  { %v285_v10 = vadd.f32 %v284_v7, %v283_v5 }
 0x358   :  { %v230_v3 = vpop.xlane.xlu1 %229 }
 0x359   :  { %368 = vrcp.f32 %v230_v3 }
 0x363   :  { %v369_v9 = vpop.eup %368 }
 0x364   :  { %v236_v11 = vrot.slane %v369_v9, %v551_v12  ;;  %v286_v13 = vrot.slane %v369_v9, 1  ;;  %v240_v16 = vrot.slane %v369_v9, %v200_v39  ;;  %v289_v18 = vmul.f32 %v369_v9, %v278_v14 }
 0x366   :  { %v243_v15 = vmul.f32 %v365_v47, %v236_v11  ;;  %v290_v17 = vmul.f32 %v286_v13, %v285_v10  ;;  %v244_v20 = vmul.f32 %v367_v48, %v240_v16 }
 0x368   :  { %248 = vperm.xlu0 %357, %v243_v15   ;;  %v293_v19 = vrot.slane %v290_v17, 7 }
 0x36a   :  { %v294_v21 = vsel %vm186_vm2, %v293_v19, %v289_v18 }
 0x36b   :  { %297 = vst.msk [vmem:[#allocation7] sm:$0x3] %vm296_vm4, %v294_v21 }
 0x36c   :  { %251 = vperm.xlu0 %357, %v244_v20  }
 0x36d   :  { %425 = shalt.err (!%p422_p6)
}
 0x36e   :  { %s426_s11 = scalar_lea.hbm %s612_s6, 32 }
 0x36f   :  { %p427_p7 = scmp.ne.s32.totalorder %s612_s6, %s426_s11  ;;  %p430_p8 = scmp.lt.u32.totalorder %s426_s11, %s612_s6 }
 0x371   :  { %p432_p9 = pnand %p430_p8, %p427_p7 }
 0x373   :  { %435 = shalt.err (!%p432_p9)
}
 0x374   :  { %307 = dma.vmem_to_hbm [thread:$0]  %s305_s5, 32, %s612_s6, [#allocation4]  }
 0x375   :  { %s475_s18 = smov [#allocation8]  }
 0x376   :  { %s314_s19 = sshll.u32 %s475_s18, 4  ;;  %s315_s19 = int_to_ptr.vmem [resolvable:$true] %s314_s19 }
 0x377   :  { %s436_s20 = scalar_lea.vmem %s315_s19, 32  ;;  %p441_p11 = scmp.lt.s32.totalorder %s315_s19, %s315_s19 }
 0x378   :  { %p437_p10 = scmp.ne.s32.totalorder %s315_s19, %s436_s20  ;;  %p442_p12 = scmp.lt.s32.totalorder %s436_s20, %s436_s20 }
 0x37a   :  { %p443_p13 = por %p442_p12, %p441_p11 }
 0x37c   :  { %p444_p0 = pnand %p443_p13, %p437_p10 }
 0x3e7   :  { %v249_v12 = vpop.permute.xlu0 %248 }
 0x3e8   :  { %v256_v23 = vrot.slane %v249_v12, %v562_v32 }
 0x3eb   :  { %v252_v22 = vpop.permute.xlu0 %251 }
 0x3ec   :  { %v260_v24 = vrot.slane %v252_v22, %v562_v32 }
 0x3ee   :  { %v261_v25 = vsel %vm186_vm2, %v260_v24, %v256_v23 }
 0x3ef   :  { %263 = vst.msk [vmem:[#allocation8] sm:$0x3] %vm189_vm3, %v261_v25 }
 0x3f0   :  { %447 = shalt.err (!%p444_p0)
}
 0x3f1   :  { %s448_s22 = scalar_lea.hbm %s613_s7, 32 }
 0x3f2   :  { %p449_p1 = scmp.ne.s32.totalorder %s613_s7, %s448_s22  ;;  %p452_p2 = scmp.lt.u32.totalorder %s448_s22, %s613_s7 }
 0x3f4   :  { %p454_p3 = pnand %p452_p2, %p449_p1 }
 0x3f6   :  { %457 = shalt.err (!%p454_p3)
}
 0x3f7   :  { %317 = dma.vmem_to_hbm [thread:$0]  %s315_s19, 32, %s613_s7, [#allocation9]  }
 0x3f8   :  { %462 = dma.done.wait [#allocation4], 32  }
 0x3f9   :  { %463 = vsyncadd [#allocation4], 4294967264 }
 0x3fa   :  { %464 = dma.done.wait [#allocation9], 32  }
 0x3fb   :  { %465 = vsyncadd [#allocation9], 4294967264 }
 0x3fc   :  { %324 = vsyncpa [#allocation3], 1 }
 0x3fd   :  { %325 = vsyncpa [#allocation6], 1 }
 0x3fe   :  { %326 = vsyncpa [#allocation4], 1 }
 0x3ff   :  { %327 = vsyncpa [#allocation9], 1 }

</bundles_post_ra>
